<compile_context>
chip_gen: v6e
topology: v6e:2x2x1
jax: 0.10.0
libtpu: 0.0.40
codegen_flags: <defaults>
</compile_context>

<pallas_src>
from functools import lru_cache

import numpy as np
import jax
import jax.numpy as jnp
from jax import lax
from jax.experimental import pallas as pl
from jax.experimental.pallas import tpu as pltpu


_LUM_TBL = np.array(
    [[16, 11, 10, 16, 24, 40, 51, 61],
     [12, 12, 14, 19, 26, 58, 60, 55],
     [14, 13, 16, 24, 40, 57, 69, 56],
     [14, 17, 22, 29, 51, 87, 80, 62],
     [18, 22, 37, 56, 68, 109, 103, 77],
     [24, 35, 55, 64, 81, 104, 113, 92],
     [49, 64, 78, 87, 103, 121, 120, 101],
     [72, 92, 95, 98, 112, 100, 103, 99]], dtype=np.float64)

_CHROM_TBL = np.array(
    [[17, 18, 24, 47, 99, 99, 99, 99],
     [18, 21, 26, 66, 99, 99, 99, 99],
     [24, 26, 56, 99, 99, 99, 99, 99],
     [47, 66, 99, 99, 99, 99, 99, 99],
     [99, 99, 99, 99, 99, 99, 99, 99],
     [99, 99, 99, 99, 99, 99, 99, 99],
     [99, 99, 99, 99, 99, 99, 99, 99],
     [99, 99, 99, 99, 99, 99, 99, 99]], dtype=np.float64)


def _dct_coff(dtype=np.float64):
    c = np.zeros((8, 8), dtype=dtype)
    c[0, :] = np.sqrt(1.0 / 8.0)
    for i in range(1, 8):
        for j in range(8):
            c[i, j] = np.cos(np.pi * i * (2 * j + 1) / 16.0) * np.sqrt(2.0 / 8.0)
    return c


def _scale_factor(Q):
    return 2.0 - Q * 0.02 if Q >= 50 else 50.0 / Q


def _quant_tables(scale_factor, dtype=np.float64):
    # torch: (tbl * scale_factor).round().clamp(min=1)
    lum = np.clip(np.round(_LUM_TBL * scale_factor), 1.0, None)
    chrom = np.clip(np.round(_CHROM_TBL * scale_factor), 1.0, None)
    return lum.astype(dtype), chrom.astype(dtype)


# ---------------------------------------------------------------------------
# Pallas kernel
# ---------------------------------------------------------------------------

def _jpeg_ss_kernel(x_ref, ch_ref, cht_ref, cw_ref, cwt_ref, qt_ref, iqt_ref, o_ref):
    # x_ref   : (1, 3, TH, TW)   RGB image tile in [-1, 1]
    # ch_ref  : (TH, TH)         kron(I, coff) block-diagonal row-DCT operator
    # cht_ref : (TH, TH)         its transpose (pre-transposed on host)
    # cw_ref  : (TW, TW)         kron(I, coff) block-diagonal col operator
    # cwt_ref : (TW, TW)         its transpose
    # qt_ref  : (3*TH, TW)       stacked quant tables (Y rows, then U, then V)
    # iqt_ref : (3*TH, TW)       reciprocal of qt
    CH = ch_ref[...]
    CHT = cht_ref[...]
    CW = cw_ref[...]
    CWT = cwt_ref[...]
    dn = (((1,), (0,)), ((), ()))

    xb = jnp.clip(x_ref[0], -1.0, 1.0)
    xb = (xb + 1.0) * (255.0 / 2.0)
    r, g, b = xb[0], xb[1], xb[2]

    # rgb -> yuv (elementwise)
    y = 0.299 * r + 0.587 * g + 0.114 * b
    u = -0.1687 * r - 0.3313 * g + 0.5 * b
    v = 0.5 * r - 0.4187 * g - 0.0813 * b

    # per-channel row DCT (CH @ plane), then stack channels along rows so the
    # width-side matmuls are batched into a single MXU dot each.
    t = jnp.concatenate(
        [lax.dot_general(CH, p, dn, preferred_element_type=jnp.float32)
         for p in (y, u, v)],
        axis=0)                                              # (3*TH, TW)

    # batched col DCT: (X @ coff^T) per 8x8 block
    d = lax.dot_general(t, CWT, dn, preferred_element_type=jnp.float32)

    # JPEG quantization (reciprocal table) + round_ss + reverse quantization
    q = d * iqt_ref[...]
    q = jnp.where(jnp.abs(q) < 0.5, q * q * q, q)            # round_ss
    dq = q * qt_ref[...]

    # batched col IDCT: (D @ coff) per block
    e = lax.dot_general(dq, CW, dn, preferred_element_type=jnp.float32)  # (3*TH, TW)

    TH = CH.shape[0]
    ey, eu, ev = e[:TH], e[TH:2 * TH], e[2 * TH:]

    # yuv2rgb is linear, so apply it before the (linear) row IDCT; each output
    # channel is written directly after its matmul (no stacked RGB temporary).
    scale = 2.0 / 255.0
    mixes = (ey + 1.40198758 * ev,
             ey - 0.344113281 * eu - 0.714103821 * ev,
             ey + 1.77197812 * eu)
    for c in range(3):
        p = lax.dot_general(CHT, mixes[c], dn, preferred_element_type=jnp.float32)
        o_ref[0, c] = jnp.clip(p * scale - 1.0, -1.0, 1.0)


@lru_cache(maxsize=None)
def _constants(th, tw, Q):
    """Host-side cached constants: block-diag DCT operators (and transposes),
    tiled quant tables stacked per YUV channel, and their reciprocals."""
    coff = _dct_coff(np.float64).astype(np.float32)
    ch = np.kron(np.eye(th // 8, dtype=np.float32), coff)          # (th, th)
    cw = np.kron(np.eye(tw // 8, dtype=np.float32), coff)          # (tw, tw)
    lum, chrom = _quant_tables(_scale_factor(Q), np.float64)
    lum_t = np.tile(lum, (th // 8, tw // 8))
    chrom_t = np.tile(chrom, (th // 8, tw // 8))
    qt64 = np.concatenate([lum_t, chrom_t, chrom_t], axis=0)       # (3*th, tw)
    qt = qt64.astype(np.float32)
    iqt = (1.0 / qt64).astype(np.float32)
    return (ch, np.ascontiguousarray(ch.T),
            cw, np.ascontiguousarray(cw.T), qt, iqt)


def jpeg_ss(x, Q=50, subsample=0):
    """Pallas implementation of JpegSS_.forward for the image tensor.

    x: (B, 3, H, W) float32 NCHW in [-1, 1].
    """
    # TODO(synk): subsample==2 chroma-replication path not implemented (module default is 0).
    assert subsample == 0
    B, C, H, W = x.shape
    assert C == 3

    # Width tile is fixed at 128: lane-dense unmasked stores, full-vreg MXU N,
    # and the block-diagonal waste of the width-side operand stays at 16x
    # (it grows as TW/8, so larger TW only burns MXU FLOPs).
    TW = 128
    Hp = -(-H // 8) * 8
    Wp = -(-W // TW) * TW

    # Height tile: multiple of 8 dividing Hp; prefer 64 (waste 8x) over 128.
    cand = [t for t in range(8, min(Hp, 128) + 1, 8) if Hp % t == 0]
    TH = 64 if 64 in cand else max(cand)

    x = x.astype(jnp.float32)
    needs_pad = (Hp != H) or (Wp != W)
    if needs_pad:
        # Padding with -1.0 before the in-kernel clamp+rescale reproduces torch's
        # ZeroPad2d in the [0,255] domain; the extra whole 8x8 blocks created by
        # the 128-padding are independent and cropped at the end.
        x_in = jnp.pad(x, ((0, 0), (0, 0), (0, Hp - H), (0, Wp - W)),
                       constant_values=-1.0)
    else:
        x_in = x

    ch_np, cht_np, cw_np, cwt_np, qt_np, iqt_np = _constants(TH, TW, int(Q))
    CH, CHT = jnp.asarray(ch_np), jnp.asarray(cht_np)
    CW, CWT = jnp.asarray(cw_np), jnp.asarray(cwt_np)
    QT, IQT = jnp.asarray(qt_np), jnp.asarray(iqt_np)

    grid = (B, Hp // TH, Wp // TW)
    n_tiles = B * (Hp // TH) * (Wp // TW)
    # 6 per-channel (TH,TH)@(TH,TW) dots + 2 batched (3TH,TW)@(TW,TW) dots per tile.
    flops = n_tiles * (12 * TH * TH * TW + 12 * TH * TW * TW)
    bytes_accessed = 4 * (2 * B * 3 * Hp * Wp
                          + 2 * TH * TH + 2 * TW * TW + 2 * 3 * TH * TW)

    out = pl.pallas_call(
        _jpeg_ss_kernel,
        out_shape=jax.ShapeDtypeStruct((B, 3, Hp, Wp), jnp.float32),
        grid=grid,
        in_specs=[
            pl.BlockSpec((1, 3, TH, TW), lambda b, i, j: (b, 0, i, j)),
            pl.BlockSpec((TH, TH), lambda b, i, j: (0, 0)),
            pl.BlockSpec((TH, TH), lambda b, i, j: (0, 0)),
            pl.BlockSpec((TW, TW), lambda b, i, j: (0, 0)),
            pl.BlockSpec((TW, TW), lambda b, i, j: (0, 0)),
            pl.BlockSpec((3 * TH, TW), lambda b, i, j: (0, 0)),
            pl.BlockSpec((3 * TH, TW), lambda b, i, j: (0, 0)),
        ],
        out_specs=pl.BlockSpec((1, 3, TH, TW), lambda b, i, j: (b, 0, i, j)),
        compiler_params=pltpu.CompilerParams(
            dimension_semantics=("parallel", "parallel", "parallel")),
        cost_estimate=pl.CostEstimate(flops=flops, transcendentals=0,
                                      bytes_accessed=bytes_accessed),
    )(x_in, CH, CHT, CW, CWT, QT, IQT)

    if needs_pad:
        out = out[:, :, :H, :W]
    return out


# ---------------------------------------------------------------------------
# float64 numpy reference (mirrors the PyTorch module) for the sanity check
# ---------------------------------------------------------------------------

def _jpeg_ss_reference_np(x, Q=50):
    x = np.asarray(x, np.float64)
    B, C, H, W = x.shape
    ph = (8 - H % 8) % 8
    pw = (8 - W % 8) % 8
    img = (np.clip(x, -1.0, 1.0) + 1.0) * 255.0 / 2.0
    img = np.pad(img, ((0, 0), (0, 0), (0, ph), (0, pw)))
    Hp, Wp = H + ph, W + pw

    r, g, b = img[:, 0], img[:, 1], img[:, 2]
    yuv = np.stack([0.299 * r + 0.587 * g + 0.114 * b,
                    -0.1687 * r - 0.3313 * g + 0.5 * b,
                    0.5 * r - 0.4187 * g - 0.0813 * b], axis=1)

    coff = _dct_coff(np.float64)
    blk = yuv.reshape(B, 3, Hp // 8, 8, Wp // 8, 8)
    dct = np.einsum('ip,bchpwq,jq->bchiwj', coff, blk, coff)

    lum, chrom = _quant_tables(_scale_factor(Q), np.float64)
    qt = np.stack([lum, chrom, chrom])[None, :, None, :, None, :]
    xq = dct / qt                                        # quantized (pre-round) coeffs
    q = np.where(np.abs(xq) < 0.5, xq ** 3, xq)          # round_ss
    dq = q * qt                                          # reverse quantization

    idct = np.einsum('pi,bchpwq,qj->bchiwj', coff, dq, coff).reshape(B, 3, Hp, Wp)
    y_, u_, v_ = idct[:, 0], idct[:, 1], idct[:, 2]
    rgb = np.stack([y_ + 1.40198758 * v_,
                    y_ - 0.344113281 * u_ - 0.714103821 * v_,
                    y_ + 1.77197812 * u_], axis=1)
    out = np.clip(rgb[:, :, :H, :W] * 2.0 / 255.0 - 1.0, -1.0, 1.0)
    return out.astype(np.float32), xq                    # xq: (B,3,Hp//8,8,Wp//8,8)


if __name__ == "__main__":
    key = jax.random.PRNGKey(0)
    B, C, H, W = 2, 3, 16, 16
    x = jax.random.uniform(key, (B, C, H, W), dtype=jnp.float32,
                           minval=-1.2, maxval=1.2)

    out = jax.block_until_ready(jpeg_ss(x, Q=50, subsample=0))
    out_np = np.asarray(out)

    ref, xq = _jpeg_ss_reference_np(np.asarray(x), Q=50)

    # round_ss is discontinuous at |x| == 0.5, so an f32-vs-f64 difference of a
    # few ulp in a DCT coefficient sitting exactly on the boundary could flip the
    # branch.  Exclude 8x8 block positions whose divided coefficients are within
    # eps of the boundary from the strict comparison (they are legitimately
    # sensitive); everything else must match tightly.
    eps = 5e-4
    near = np.abs(np.abs(xq) - 0.5) < eps                 # (B, 3, hb, 8, wb, 8)
    bad_blk = near.any(axis=(1, 3, 5))                    # (B, hb, wb)
    bad_pix = np.repeat(np.repeat(bad_blk, 8, axis=1), 8, axis=2)[:, :H, :W]
    ok = np.broadcast_to(~bad_pix[:, None, :, :], out_np.shape)

    assert ok.mean() >= 0.25, f"too few comparable pixels: {ok.mean()}"
    np.testing.assert_allclose(out_np[ok], ref[ok], rtol=1e-2, atol=1e-2)
    assert out_np.shape == (B, C, H, W) and bool(np.all(np.isfinite(out_np)))
    print("KERNEL_OK")
</pallas_src>

<mosaic_0001>
module attributes {stable_mosaic.version = 11 : i64} {
  func.func @_jpeg_ss_kernel(%arg0: i32, %arg1: i32, %arg2: i32, %arg3: memref<1x3x16x128xf32, #tpu.memory_space<vmem>>, %arg4: memref<16x16xf32, #tpu.memory_space<vmem>>, %arg5: memref<16x16xf32, #tpu.memory_space<vmem>>, %arg6: memref<128x128xf32, #tpu.memory_space<vmem>>, %arg7: memref<128x128xf32, #tpu.memory_space<vmem>>, %arg8: memref<48x128xf32, #tpu.memory_space<vmem>>, %arg9: memref<48x128xf32, #tpu.memory_space<vmem>>, %arg10: memref<1x3x16x128xf32, #tpu.memory_space<vmem>>) attributes {dimension_semantics = [#tpu.dimension_semantics<parallel>, #tpu.dimension_semantics<parallel>, #tpu.dimension_semantics<parallel>], iteration_bounds = array<i64: 2, 1, 1>, scalar_prefetch = 0 : i64, scratch_operands = 0 : i64, tpu.core_type = #tpu.core_type<tc>, window_params = [{transform_indices = @transform_0, window_bounds = array<i64: 1, 3, 16, 128>}, {pipeline_mode = #tpu.pipeline_mode<synchronous>, transform_indices = @transform_1, window_bounds = array<i64: 16, 16>}, {pipeline_mode = #tpu.pipeline_mode<synchronous>, transform_indices = @transform_2, window_bounds = array<i64: 16, 16>}, {pipeline_mode = #tpu.pipeline_mode<synchronous>, transform_indices = @transform_3, window_bounds = array<i64: 128, 128>}, {pipeline_mode = #tpu.pipeline_mode<synchronous>, transform_indices = @transform_4, window_bounds = array<i64: 128, 128>}, {pipeline_mode = #tpu.pipeline_mode<synchronous>, transform_indices = @transform_5, window_bounds = array<i64: 48, 128>}, {pipeline_mode = #tpu.pipeline_mode<synchronous>, transform_indices = @transform_6, window_bounds = array<i64: 48, 128>}, {transform_indices = @transform_7, window_bounds = array<i64: 1, 3, 16, 128>}]} {
    %c0 = arith.constant 0 : index
    %c0_0 = arith.constant 0 : index
    %0 = vector.load %arg4[%c0, %c0_0] : memref<16x16xf32, #tpu.memory_space<vmem>>, vector<16x16xf32>
    %c0_1 = arith.constant 0 : index
    %c0_2 = arith.constant 0 : index
    %1 = vector.load %arg5[%c0_1, %c0_2] : memref<16x16xf32, #tpu.memory_space<vmem>>, vector<16x16xf32>
    %c0_3 = arith.constant 0 : index
    %c0_4 = arith.constant 0 : index
    %2 = vector.load %arg6[%c0_3, %c0_4] : memref<128x128xf32, #tpu.memory_space<vmem>>, vector<128x128xf32>
    %c0_5 = arith.constant 0 : index
    %c0_6 = arith.constant 0 : index
    %3 = vector.load %arg7[%c0_5, %c0_6] : memref<128x128xf32, #tpu.memory_space<vmem>>, vector<128x128xf32>
    %c0_7 = arith.constant 0 : index
    %c0_8 = arith.constant 0 : index
    %c0_9 = arith.constant 0 : index
    %c0_10 = arith.constant 0 : index
    %4 = vector.load %arg3[%c0_7, %c0_8, %c0_9, %c0_10] : memref<1x3x16x128xf32, #tpu.memory_space<vmem>>, vector<1x3x16x128xf32>
    %5 = vector.shape_cast %4 : vector<1x3x16x128xf32> to vector<3x16x128xf32>
    %cst = arith.constant -1.000000e+00 : f32
    %cst_11 = arith.constant 1.000000e+00 : f32
    %6 = vector.broadcast %cst : f32 to vector<3x16x128xf32>
    %7 = arith.maximumf %6, %5 : vector<3x16x128xf32>
    %8 = vector.broadcast %cst_11 : f32 to vector<3x16x128xf32>
    %9 = arith.minimumf %8, %7 : vector<3x16x128xf32>
    %cst_12 = arith.constant 1.000000e+00 : f32
    %10 = vector.broadcast %cst_12 : f32 to vector<3x16x128xf32>
    %11 = arith.addf %9, %10 : vector<3x16x128xf32>
    %cst_13 = arith.constant 1.275000e+02 : f32
    %12 = vector.broadcast %cst_13 : f32 to vector<3x16x128xf32>
    %13 = arith.mulf %11, %12 : vector<3x16x128xf32>
    %14 = vector.extract_strided_slice %13 {offsets = [0, 0, 0], sizes = [1, 16, 128], strides = [1, 1, 1]} : vector<3x16x128xf32> to vector<1x16x128xf32>
    %15 = vector.shape_cast %14 : vector<1x16x128xf32> to vector<16x128xf32>
    %16 = vector.extract_strided_slice %13 {offsets = [1, 0, 0], sizes = [1, 16, 128], strides = [1, 1, 1]} : vector<3x16x128xf32> to vector<1x16x128xf32>
    %17 = vector.shape_cast %16 : vector<1x16x128xf32> to vector<16x128xf32>
    %18 = vector.extract_strided_slice %13 {offsets = [2, 0, 0], sizes = [1, 16, 128], strides = [1, 1, 1]} : vector<3x16x128xf32> to vector<1x16x128xf32>
    %19 = vector.shape_cast %18 : vector<1x16x128xf32> to vector<16x128xf32>
    %cst_14 = arith.constant 2.990000e-01 : f32
    %20 = vector.broadcast %cst_14 : f32 to vector<16x128xf32>
    %21 = arith.mulf %20, %15 : vector<16x128xf32>
    %cst_15 = arith.constant 5.870000e-01 : f32
    %22 = vector.broadcast %cst_15 : f32 to vector<16x128xf32>
    %23 = arith.mulf %22, %17 : vector<16x128xf32>
    %24 = arith.addf %21, %23 : vector<16x128xf32>
    %cst_16 = arith.constant 1.140000e-01 : f32
    %25 = vector.broadcast %cst_16 : f32 to vector<16x128xf32>
    %26 = arith.mulf %25, %19 : vector<16x128xf32>
    %27 = arith.addf %24, %26 : vector<16x128xf32>
    %cst_17 = arith.constant -1.687000e-01 : f32
    %28 = vector.broadcast %cst_17 : f32 to vector<16x128xf32>
    %29 = arith.mulf %28, %15 : vector<16x128xf32>
    %cst_18 = arith.constant 3.313000e-01 : f32
    %30 = vector.broadcast %cst_18 : f32 to vector<16x128xf32>
    %31 = arith.mulf %30, %17 : vector<16x128xf32>
    %32 = arith.subf %29, %31 : vector<16x128xf32>
    %cst_19 = arith.constant 5.000000e-01 : f32
    %33 = vector.broadcast %cst_19 : f32 to vector<16x128xf32>
    %34 = arith.mulf %33, %19 : vector<16x128xf32>
    %35 = arith.addf %32, %34 : vector<16x128xf32>
    %cst_20 = arith.constant 5.000000e-01 : f32
    %36 = vector.broadcast %cst_20 : f32 to vector<16x128xf32>
    %37 = arith.mulf %36, %15 : vector<16x128xf32>
    %cst_21 = arith.constant 4.187000e-01 : f32
    %38 = vector.broadcast %cst_21 : f32 to vector<16x128xf32>
    %39 = arith.mulf %38, %17 : vector<16x128xf32>
    %40 = arith.subf %37, %39 : vector<16x128xf32>
    %cst_22 = arith.constant 0.0812999978 : f32
    %41 = vector.broadcast %cst_22 : f32 to vector<16x128xf32>
    %42 = arith.mulf %41, %19 : vector<16x128xf32>
    %43 = arith.subf %40, %42 : vector<16x128xf32>
    %cst_23 = arith.constant dense<0.000000e+00> : vector<16x128xf32>
    %44 = tpu.matmul %0, %27, %cst_23 {dimension_numbers = #tpu.dot_dimension_numbers<[1], [0], [0], [1], [0, 0, 1, 1], [], []>} : vector<16x16xf32>, vector<16x128xf32>, vector<16x128xf32> -> vector<16x128xf32>
    %cst_24 = arith.constant dense<0.000000e+00> : vector<16x128xf32>
    %45 = tpu.matmul %0, %35, %cst_24 {dimension_numbers = #tpu.dot_dimension_numbers<[1], [0], [0], [1], [0, 0, 1, 1], [], []>} : vector<16x16xf32>, vector<16x128xf32>, vector<16x128xf32> -> vector<16x128xf32>
    %cst_25 = arith.constant dense<0.000000e+00> : vector<16x128xf32>
    %46 = tpu.matmul %0, %43, %cst_25 {dimension_numbers = #tpu.dot_dimension_numbers<[1], [0], [0], [1], [0, 0, 1, 1], [], []>} : vector<16x16xf32>, vector<16x128xf32>, vector<16x128xf32> -> vector<16x128xf32>
    %47 = tpu.concatenate %44, %45, %46 in 0 : vector<16x128xf32>, vector<16x128xf32>, vector<16x128xf32> -> vector<48x128xf32>
    %cst_26 = arith.constant dense<0.000000e+00> : vector<48x128xf32>
    %48 = tpu.matmul %47, %3, %cst_26 {dimension_numbers = #tpu.dot_dimension_numbers<[1], [0], [0], [1], [0, 0, 1, 1], [], []>} : vector<48x128xf32>, vector<128x128xf32>, vector<48x128xf32> -> vector<48x128xf32>
    %c0_27 = arith.constant 0 : index
    %c0_28 = arith.constant 0 : index
    %49 = vector.load %arg9[%c0_27, %c0_28] : memref<48x128xf32, #tpu.memory_space<vmem>>, vector<48x128xf32>
    %50 = arith.mulf %48, %49 : vector<48x128xf32>
    %51 = math.absf %50 : vector<48x128xf32>
    %cst_29 = arith.constant 5.000000e-01 : f32
    %52 = vector.broadcast %cst_29 : f32 to vector<48x128xf32>
    %53 = arith.cmpf olt, %51, %52 : vector<48x128xf32>
    %54 = arith.mulf %50, %50 : vector<48x128xf32>
    %55 = arith.mulf %54, %50 : vector<48x128xf32>
    %56 = arith.select %53, %55, %50 : vector<48x128xi1>, vector<48x128xf32>
    %c0_30 = arith.constant 0 : index
    %c0_31 = arith.constant 0 : index
    %57 = vector.load %arg8[%c0_30, %c0_31] : memref<48x128xf32, #tpu.memory_space<vmem>>, vector<48x128xf32>
    %58 = arith.mulf %56, %57 : vector<48x128xf32>
    %cst_32 = arith.constant dense<0.000000e+00> : vector<48x128xf32>
    %59 = tpu.matmul %58, %2, %cst_32 {dimension_numbers = #tpu.dot_dimension_numbers<[1], [0], [0], [1], [0, 0, 1, 1], [], []>} : vector<48x128xf32>, vector<128x128xf32>, vector<48x128xf32> -> vector<48x128xf32>
    %60 = vector.extract_strided_slice %59 {offsets = [0, 0], sizes = [16, 128], strides = [1, 1]} : vector<48x128xf32> to vector<16x128xf32>
    %61 = vector.extract_strided_slice %59 {offsets = [16, 0], sizes = [16, 128], strides = [1, 1]} : vector<48x128xf32> to vector<16x128xf32>
    %62 = vector.extract_strided_slice %59 {offsets = [32, 0], sizes = [16, 128], strides = [1, 1]} : vector<48x128xf32> to vector<16x128xf32>
    %cst_33 = arith.constant 1.40198755 : f32
    %63 = vector.broadcast %cst_33 : f32 to vector<16x128xf32>
    %64 = arith.mulf %63, %62 : vector<16x128xf32>
    %65 = arith.addf %60, %64 : vector<16x128xf32>
    %cst_34 = arith.constant 0.34411329 : f32
    %66 = vector.broadcast %cst_34 : f32 to vector<16x128xf32>
    %67 = arith.mulf %66, %61 : vector<16x128xf32>
    %68 = arith.subf %60, %67 : vector<16x128xf32>
    %cst_35 = arith.constant 0.714103818 : f32
    %69 = vector.broadcast %cst_35 : f32 to vector<16x128xf32>
    %70 = arith.mulf %69, %62 : vector<16x128xf32>
    %71 = arith.subf %68, %70 : vector<16x128xf32>
    %cst_36 = arith.constant 1.77197814 : f32
    %72 = vector.broadcast %cst_36 : f32 to vector<16x128xf32>
    %73 = arith.mulf %72, %61 : vector<16x128xf32>
    %74 = arith.addf %60, %73 : vector<16x128xf32>
    %cst_37 = arith.constant dense<0.000000e+00> : vector<16x128xf32>
    %75 = tpu.matmul %1, %65, %cst_37 {dimension_numbers = #tpu.dot_dimension_numbers<[1], [0], [0], [1], [0, 0, 1, 1], [], []>} : vector<16x16xf32>, vector<16x128xf32>, vector<16x128xf32> -> vector<16x128xf32>
    %cst_38 = arith.constant 0.00784313772 : f32
    %76 = vector.broadcast %cst_38 : f32 to vector<16x128xf32>
    %77 = arith.mulf %75, %76 : vector<16x128xf32>
    %cst_39 = arith.constant 1.000000e+00 : f32
    %78 = vector.broadcast %cst_39 : f32 to vector<16x128xf32>
    %79 = arith.subf %77, %78 : vector<16x128xf32>
    %cst_40 = arith.constant -1.000000e+00 : f32
    %cst_41 = arith.constant 1.000000e+00 : f32
    %80 = vector.broadcast %cst_40 : f32 to vector<16x128xf32>
    %81 = arith.maximumf %80, %79 : vector<16x128xf32>
    %82 = vector.broadcast %cst_41 : f32 to vector<16x128xf32>
    %83 = arith.minimumf %82, %81 : vector<16x128xf32>
    %c0_42 = arith.constant 0 : index
    %c0_43 = arith.constant 0 : index
    %c0_44 = arith.constant 0 : index
    %c0_45 = arith.constant 0 : index
    %84 = vector.load %arg10[%c0_42, %c0_43, %c0_44, %c0_45] : memref<1x3x16x128xf32, #tpu.memory_space<vmem>>, vector<1x1x16x128xf32>
    %85 = vector.shape_cast %84 : vector<1x1x16x128xf32> to vector<16x128xf32>
    %86 = vector.shape_cast %83 : vector<16x128xf32> to vector<1x1x16x128xf32>
    tpu.vector_store %arg10[%c0_42, %c0_43, %c0_44, %c0_45], %86 {strides = array<i32>} : memref<1x3x16x128xf32, #tpu.memory_space<vmem>>, vector<1x1x16x128xf32>,
    %cst_46 = arith.constant dense<0.000000e+00> : vector<16x128xf32>
    %87 = tpu.matmul %1, %71, %cst_46 {dimension_numbers = #tpu.dot_dimension_numbers<[1], [0], [0], [1], [0, 0, 1, 1], [], []>} : vector<16x16xf32>, vector<16x128xf32>, vector<16x128xf32> -> vector<16x128xf32>
    %cst_47 = arith.constant 0.00784313772 : f32
    %88 = vector.broadcast %cst_47 : f32 to vector<16x128xf32>
    %89 = arith.mulf %87, %88 : vector<16x128xf32>
    %cst_48 = arith.constant 1.000000e+00 : f32
    %90 = vector.broadcast %cst_48 : f32 to vector<16x128xf32>
    %91 = arith.subf %89, %90 : vector<16x128xf32>
    %cst_49 = arith.constant -1.000000e+00 : f32
    %cst_50 = arith.constant 1.000000e+00 : f32
    %92 = vector.broadcast %cst_49 : f32 to vector<16x128xf32>
    %93 = arith.maximumf %92, %91 : vector<16x128xf32>
    %94 = vector.broadcast %cst_50 : f32 to vector<16x128xf32>
    %95 = arith.minimumf %94, %93 : vector<16x128xf32>
    %c0_51 = arith.constant 0 : index
    %c1 = arith.constant 1 : index
    %c0_52 = arith.constant 0 : index
    %c0_53 = arith.constant 0 : index
    %96 = vector.load %arg10[%c0_51, %c1, %c0_52, %c0_53] : memref<1x3x16x128xf32, #tpu.memory_space<vmem>>, vector<1x1x16x128xf32>
    %97 = vector.shape_cast %96 : vector<1x1x16x128xf32> to vector<16x128xf32>
    %98 = vector.shape_cast %95 : vector<16x128xf32> to vector<1x1x16x128xf32>
    tpu.vector_store %arg10[%c0_51, %c1, %c0_52, %c0_53], %98 {strides = array<i32>} : memref<1x3x16x128xf32, #tpu.memory_space<vmem>>, vector<1x1x16x128xf32>,
    %cst_54 = arith.constant dense<0.000000e+00> : vector<16x128xf32>
    %99 = tpu.matmul %1, %74, %cst_54 {dimension_numbers = #tpu.dot_dimension_numbers<[1], [0], [0], [1], [0, 0, 1, 1], [], []>} : vector<16x16xf32>, vector<16x128xf32>, vector<16x128xf32> -> vector<16x128xf32>
    %cst_55 = arith.constant 0.00784313772 : f32
    %100 = vector.broadcast %cst_55 : f32 to vector<16x128xf32>
    %101 = arith.mulf %99, %100 : vector<16x128xf32>
    %cst_56 = arith.constant 1.000000e+00 : f32
    %102 = vector.broadcast %cst_56 : f32 to vector<16x128xf32>
    %103 = arith.subf %101, %102 : vector<16x128xf32>
    %cst_57 = arith.constant -1.000000e+00 : f32
    %cst_58 = arith.constant 1.000000e+00 : f32
    %104 = vector.broadcast %cst_57 : f32 to vector<16x128xf32>
    %105 = arith.maximumf %104, %103 : vector<16x128xf32>
    %106 = vector.broadcast %cst_58 : f32 to vector<16x128xf32>
    %107 = arith.minimumf %106, %105 : vector<16x128xf32>
    %c0_59 = arith.constant 0 : index
    %c2 = arith.constant 2 : index
    %c0_60 = arith.constant 0 : index
    %c0_61 = arith.constant 0 : index
    %108 = vector.load %arg10[%c0_59, %c2, %c0_60, %c0_61] : memref<1x3x16x128xf32, #tpu.memory_space<vmem>>, vector<1x1x16x128xf32>
    %109 = vector.shape_cast %108 : vector<1x1x16x128xf32> to vector<16x128xf32>
    %110 = vector.shape_cast %107 : vector<16x128xf32> to vector<1x1x16x128xf32>
    tpu.vector_store %arg10[%c0_59, %c2, %c0_60, %c0_61], %110 {strides = array<i32>} : memref<1x3x16x128xf32, #tpu.memory_space<vmem>>, vector<1x1x16x128xf32>,
    return
  }
  func.func @transform_0(%arg0: i32, %arg1: i32, %arg2: i32) -> (i32, i32, i32, i32) {
    %c0_i32 = arith.constant 0 : i32
    %c0_i32_0 = arith.constant 0 : i32
    return %arg0, %c0_i32, %arg1, %arg2 : i32, i32, i32, i32
  }
  func.func @transform_1(%arg0: i32, %arg1: i32, %arg2: i32) -> (i32, i32) {
    %c0_i32 = arith.constant 0 : i32
    %c0_i32_0 = arith.constant 0 : i32
    %c0_i32_1 = arith.constant 0 : i32
    return %c0_i32, %c0_i32_0 : i32, i32
  }
  func.func @transform_2(%arg0: i32, %arg1: i32, %arg2: i32) -> (i32, i32) {
    %c0_i32 = arith.constant 0 : i32
    %c0_i32_0 = arith.constant 0 : i32
    %c0_i32_1 = arith.constant 0 : i32
    return %c0_i32, %c0_i32_0 : i32, i32
  }
  func.func @transform_3(%arg0: i32, %arg1: i32, %arg2: i32) -> (i32, i32) {
    %c0_i32 = arith.constant 0 : i32
    %c0_i32_0 = arith.constant 0 : i32
    %c0_i32_1 = arith.constant 0 : i32
    return %c0_i32, %c0_i32_0 : i32, i32
  }
  func.func @transform_4(%arg0: i32, %arg1: i32, %arg2: i32) -> (i32, i32) {
    %c0_i32 = arith.constant 0 : i32
    %c0_i32_0 = arith.constant 0 : i32
    %c0_i32_1 = arith.constant 0 : i32
    return %c0_i32, %c0_i32_0 : i32, i32
  }
  func.func @transform_5(%arg0: i32, %arg1: i32, %arg2: i32) -> (i32, i32) {
    %c0_i32 = arith.constant 0 : i32
    %c0_i32_0 = arith.constant 0 : i32
    %c0_i32_1 = arith.constant 0 : i32
    return %c0_i32, %c0_i32_0 : i32, i32
  }
  func.func @transform_6(%arg0: i32, %arg1: i32, %arg2: i32) -> (i32, i32) {
    %c0_i32 = arith.constant 0 : i32
    %c0_i32_0 = arith.constant 0 : i32
    %c0_i32_1 = arith.constant 0 : i32
    return %c0_i32, %c0_i32_0 : i32, i32
  }
  func.func @transform_7(%arg0: i32, %arg1: i32, %arg2: i32) -> (i32, i32, i32, i32) {
    %c0_i32 = arith.constant 0 : i32
    %c0_i32_0 = arith.constant 0 : i32
    return %arg0, %c0_i32, %arg1, %arg2 : i32, i32, i32, i32
  }
}

</mosaic_0001>

<bundles_post_ra>
// kernel: tpu_custom_call.1
= control target key start
LH: loop header
LB: loop body
LE: loop exit
PB: predicated region body
PF: predicated region fallthrough
CT: control target
= control target key end

     0   :  { %s2418_s0 = inlined_call_operand.hbm [shape: f32[2,3,16,128], index: 0, kind: input, shape index: {}]   ;;  %s2419_s1 = inlined_call_operand.hbm [shape: f32[16,16], index: 1, kind: input, shape index: {}]   ;;  %s2420_s2 = inlined_call_operand.hbm [shape: f32[16,16], index: 2, kind: input, shape index: {}]   ;;  %s2421_s3 = inlined_call_operand.hbm [shape: f32[128,128], index: 3, kind: input, shape index: {}]   ;;  %s2422_s4 = inlined_call_operand.hbm [shape: f32[128,128], index: 4, kind: input, shape index: {}]   ;;  %s2423_s5 = inlined_call_operand.hbm [shape: f32[48,128], index: 5, kind: input, shape index: {}]   ;;  %s2424_s6 = inlined_call_operand.hbm [shape: f32[48,128], index: 6, kind: input, shape index: {}]   ;;  %s2425_s7 = inlined_call_operand.hbm [shape: f32[2,3,16,128], index: 7, kind: output, shape index: {}]  }
   0x1   :  { %2428 = sst [smem:[#allocation20_spill]] %s2419_s1 }
   0x2   :  { %2429 = sst [smem:[#allocation21_spill]] %s2420_s2 }
   0x3   :  { %2430 = sst [smem:[#allocation22_spill]] %s2421_s3 }
   0x4   :  { %2431 = sst [smem:[#allocation23_spill]] %s2422_s4 }
   0x5   :  { %12 = vsyncpa [#allocation3], 0 }
   0x6   :  { %14 = vsyncpa [#allocation3 + $0x1], 0 }
   0x7   :  { %15 = vsyncpa [#allocation6], 0 }
   0x8   :  { %16 = vsyncpa [#allocation9], 0 }
   0x9   :  { %17 = vsyncpa [#allocation12], 0 }
   0xa   :  { %18 = vsyncpa [#allocation4], 0 }
   0xb   :  { %20 = vsyncpa [#allocation4 + $0x1], 0  ;;  %s2141_s24 = smov 0   ;;  %s2143_s25 = smov 0  }
   0xc   :  { %s2145_s26 = smov 0   ;;  %s2147_s27 = smov 0  }
   0xd   :  { %s2149_s28 = smov 0   ;;  %s2151_s29 = smov 0  }
   0xe LB: > { %s1433_s30 = sadd.s32 4294967295, %s2087_s29   ;;  %p1435_p0 = scmp.ge.s32.totalorder %s2087_s29, 1  ;;  %s2087_s29 = sphi %s2151_s29, %s26_s29   ;;  %s2083_s28 = sphi %s2149_s28, %s2456_s28   ;;  %s2079_s27 = sphi %s2147_s27, %s2455_s27   ;;  %s2075_s26 = sphi %s2145_s26, %s2454_s26   ;;  %s2071_s25 = sphi %s2143_s25, %s2453_s25   ;;  %s2067_s24 = sphi %s2141_s24, %s2452_s24  }
   0xf   : > { %p2175_p1 = scmp.eq.s32.totalorder %s1433_s30, 0  ;;  %p236_p2 = scmp.lt.s32.totalorder %s2087_s29, 3 }
  0x10   : > { %s2089_s10 = smov [#allocation5]   ;;  %s2090_s13 = smov [#allocation8]  }
  0x11   : > { %p2180_p3 = pnand %p1435_p0, %p236_p2  ;;  %s248_s11 = sshll.u32 %s2089_s10, 4  ;;  %s249_s11 = int_to_ptr.vmem [resolvable:$true] %s248_s11 }
  0x12   : > { %s274_s14 = sshll.u32 %s2090_s13, 4  ;;  %s2091_s15 = smov [#allocation11]   ;;  %s275_s14 = int_to_ptr.vmem [resolvable:$true] %s274_s14 }
  0x13   : > { %p1712_p4 = pneg %p2180_p3  ;;  %s300_s16 = sshll.u32 %s2091_s15, 4  ;;  %s301_s16 = int_to_ptr.vmem [resolvable:$true] %s300_s16 }
  0x14   : > { %s1822_s18 = scalar_lea.vmem %s249_s11, 256  ;;  %p1830_p11 = scmp.lt.s32.totalorder %s249_s11, %s249_s11 }
  0x15   : > { %p2189_p6 = pnand %p1712_p4, %p2175_p1  ;;  %p1823_p8 = scmp.ne.s32.totalorder %s249_s11, %s1822_s18 }
  0x16   : > { %p1831_p12 = scmp.lt.s32.totalorder %s1822_s18, %s1822_s18 }
  0x17   : > { %p2195_p7 = pneg %p2189_p6 }
  0x18   : > { %p1832_p13 = por %p1831_p12, %p1830_p11 }
  0x19   : > { %p1825_p9 = pnand %p1823_p8, %p2195_p7 }
  0x1b   : > { %p1826_p10 = pneg %p1825_p9 }
  0x1d   : > { %p1833_p0 = pnand %p1832_p13, %p1826_p10 }
  0x1f   : > { %1836 = shalt.err (!%p1833_p0)
}
  0x20   : > { %s2426_s19 = smov 128   ;;  %s2427_s20 = smov 8  }
  0x21   : > { %s2436_s1 = sld [smem:[#allocation20_spill]]  ;;  %s1848_s23 = scalar_lea.vmem %s275_s14, 2048 }
  0x22   : > { %p1849_p2 = scmp.ne.s32.totalorder %s275_s14, %s1848_s23  ;;  %p1856_p9 = scmp.lt.s32.totalorder %s275_s14, %s275_s14 }
  0x23   : > { %p1857_p10 = scmp.lt.s32.totalorder %s1848_s23, %s1848_s23 }
  0x24   : > { %p1851_p4 = pnand %p1849_p2, %p2195_p7 }
  0x25   : > { %p1858_p11 = por %p1857_p10, %p1856_p9 }
  0x26   : > { %p1852_p8 = pneg %p1851_p4 }
  0x27   : > { %1715 = dma.hbm_to_vmem [thread:$0]  (!%p2189_p6), %s2436_s1, 256, %s249_s11, [#allocation6], %s2426_s19, %s2426_s19, %s2427_s20  }
  0x28   : > { %p1859_p12 = pnand %p1858_p11, %p1852_p8 }
  0x2a   : > { %1862 = shalt.err (!%p1859_p12)
}
  0x2b   : > { %s2437_s3 = sld [smem:[#allocation22_spill]]  ;;  %s1874_s11 = scalar_lea.vmem %s301_s16, 768 }
  0x2c   : > { %p1875_p13 = scmp.ne.s32.totalorder %s301_s16, %s1874_s11  ;;  %p1882_p4 = scmp.lt.s32.totalorder %s301_s16, %s301_s16 }
  0x2d   : > { %p1883_p9 = scmp.lt.s32.totalorder %s1874_s11, %s1874_s11 }
  0x2e   : > { %p1877_p0 = pnand %p1875_p13, %p2195_p7 }
  0x2f   : > { %p1884_p8 = por %p1883_p9, %p1882_p4 }
  0x30   : > { %p1878_p2 = pneg %p1877_p0 }
  0x31   : > { %1721 = dma.hbm_to_vmem [thread:$0]  (!%p2189_p6), %s2437_s3, 2048, %s275_s14, [#allocation9], %s2426_s19, %s2426_s19, %s2427_s20  }
  0x32   : > { %p1885_p10 = pnand %p1884_p8, %p1878_p2 }
  0x34   : > { %1888 = shalt.err (!%p1885_p10)
}
  0x35   : > { %1727 = dma.hbm_to_vmem [thread:$0]  (!%p2189_p6), %s2423_s5, 768, %s301_s16, [#allocation12], %s2426_s19, %s2426_s19, %s2427_s20  }
  0x36   : > { %s2094_s14 = smov [#allocation7]   ;;  %s2095_s22 = smov [#allocation10]  }
  0x37   : > { %s261_s21 = sshll.u32 %s2094_s14, 4  ;;  %s287_s23 = sshll.u32 %s2095_s22, 4  ;;  %s262_s21 = int_to_ptr.vmem [resolvable:$true] %s261_s21  ;;  %s288_s23 = int_to_ptr.vmem [resolvable:$true] %s287_s23 }
  0x38   : > { %s1900_s10 = scalar_lea.vmem %s262_s21, 256  ;;  %p1908_p0 = scmp.lt.s32.totalorder %s262_s21, %s262_s21 }
  0x39   : > { %p1901_p11 = scmp.ne.s32.totalorder %s262_s21, %s1900_s10  ;;  %p1909_p2 = scmp.lt.s32.totalorder %s1900_s10, %s1900_s10 }
  0x3b   : > { %p1903_p12 = pnand %p1901_p11, %p2195_p7  ;;  %p1910_p4 = por %p1909_p2, %p1908_p0 }
  0x3d   : > { %p1904_p13 = pneg %p1903_p12 }
  0x3f   : > { %p1911_p9 = pnand %p1910_p4, %p1904_p13 }
  0x41   : > { %1914 = shalt.err (!%p1911_p9)
}
  0x42   : > { %s2438_s2 = sld [smem:[#allocation21_spill]]  ;;  %s1926_s11 = scalar_lea.vmem %s288_s23, 2048 }
  0x43   : > { %p1927_p8 = scmp.ne.s32.totalorder %s288_s23, %s1926_s11  ;;  %p1934_p12 = scmp.lt.s32.totalorder %s288_s23, %s288_s23 }
  0x44   : > { %p1935_p0 = scmp.lt.s32.totalorder %s1926_s11, %s1926_s11 }
  0x45   : > { %p1929_p10 = pnand %p1927_p8, %p2195_p7 }
  0x46   : > { %p1936_p13 = por %p1935_p0, %p1934_p12 }
  0x47   : > { %p1930_p11 = pneg %p1929_p10 }
  0x48   : > { %1718 = dma.hbm_to_vmem [thread:$0]  (!%p2189_p6), %s2438_s2, 256, %s262_s21, [#allocation6], %s2426_s19, %s2426_s19, %s2427_s20  }
  0x49   : > { %p1937_p2 = pnand %p1936_p13, %p1930_p11 }
  0x4b   : > { %1940 = shalt.err (!%p1937_p2)
}
  0x4c   : > { %s2439_s4 = sld [smem:[#allocation23_spill]]  ;;  %s2096_s14 = smov [#allocation13]  }
  0x4d   : > { %s313_s21 = sshll.u32 %s2096_s14, 4  ;;  %s314_s21 = int_to_ptr.vmem [resolvable:$true] %s313_s21 }
  0x4e   : > { %s1952_s22 = scalar_lea.vmem %s314_s21, 768  ;;  %p1960_p10 = scmp.lt.s32.totalorder %s314_s21, %s314_s21 }
  0x4f   : > { %p1953_p4 = scmp.ne.s32.totalorder %s314_s21, %s1952_s22  ;;  %p1961_p11 = scmp.lt.s32.totalorder %s1952_s22, %s1952_s22 }
  0x51   : > { %p1955_p9 = pnand %p1953_p4, %p2195_p7  ;;  %p1962_p12 = por %p1961_p11, %p1960_p10 }
  0x52   : > { %1724 = dma.hbm_to_vmem [thread:$0]  (!%p2189_p6), %s2439_s4, 2048, %s288_s23, [#allocation9], %s2426_s19, %s2426_s19, %s2427_s20  }
  0x53   : > { %p1956_p8 = pneg %p1955_p9 }
  0x55   : > { %p1963_p0 = pnand %p1962_p12, %p1956_p8 }
  0x57   : > { %1966 = shalt.err (!%p1963_p0)
}
  0x58   : > { %1730 = dma.hbm_to_vmem [thread:$0]  (!%p2189_p6), %s2424_s6, 768, %s314_s21, [#allocation12], %s2426_s19, %s2426_s19, %s2427_s20  }
  0x59   : > { %s1434_s12 = sadd.s32 4294967294, %s2087_s29   ;;  %s45_s17 = sadd.s32 1, %s2083_s28 }
  0x5a   : > { %p47_p7 = scmp.ge.s32.totalorder %s45_s17, 2  ;;  %s56_s16 = sadd.s32 1, %s2075_s26 }
  0x5b   : > { %p63_p13 = scmp.ne.s32.totalorder %s2075_s26, %s2071_s25  ;;  %p64_p2 = scmp.eq.s32.totalorder %s2087_s29, 0 }
  0x5c   : > { %s2458_s17 = smov (%p47_p7, %s45_s17), 0  ;;  %p69_p9 = scmp.ne.s32.totalorder %s2071_s25, %s2067_s24 }
  0x5d   : > { %p2267_p4 = por %p64_p2, %p63_p13  ;;  %s49_s11 = ssub.s32 %s2083_s28, %s2458_s17 }
  0x5e   : > { %p223_p6 = scmp.eq.s32.totalorder %s1433_s30, 1  ;;  %p54_p8 = scmp.eq.s32.totalorder %s49_s11, 0 }
  0x5f   : > { %p2279_p10 = por %p2175_p1, %p69_p9  ;;  %p229_p12 = scmp.eq.s32.totalorder %s1434_s12, 1 }
  0x60   : > { %p2283_p11 = por %p223_p6, %p63_p13  ;;  %p1745_p7 = scmp.lt.s32.totalorder %s2087_s29, 2 }
  0x61   : > { %s2288_s14 = scalar_select %p54_p8, %s2075_s26, %s56_s16  }
  0x62   : > { %p2290_p0 = por %p229_p12, %p69_p9  ;;  %s327_s22 = sand.u32 1, %s2075_s26  }
  0x63   : > { %s1681_s30 = smul.u32 768, %s2083_s28  ;;  %p2299_p2 = pnand %p1745_p7, %p2267_p4 }
  0x64   : > { %s1680_s10 = smul.u32 48, %s327_s22  ;;  %s328_s1 = scalar_lea.sflag [#allocation3], %s327_s22 }
  0x65   : > { %s340_s12 = scalar_lea.hbm %s2418_s0, %s1681_s30  ;;  %p1969_p13 = pneg %p2299_p2 }
  0x66   : > { %s331_s16 = scalar_lea.vmem [#allocation2], %s1680_s10  ;;  %s2097_s13 = smov [#allocation2]  }
  0x67   : > { %s341_s20 = sshll.u32 %s331_s16, 4  ;;  %s1985_s3 = sshll.u32 %s2097_s13, 4  ;;  %s342_s20 = int_to_ptr.vmem [resolvable:$true] %s341_s20  ;;  %s1986_s3 = int_to_ptr.vmem [resolvable:$false] %s1985_s3 }
  0x68   : > { %s1980_s2 = scalar_lea.vmem %s342_s20, 768  ;;  %s1987_s4 = scalar_lea.vmem %s1986_s3, 1536 }
  0x69   : > { %p1981_p9 = scmp.ne.s32.totalorder %s342_s20, %s1980_s2  ;;  %p1988_p4 = scmp.lt.s32.totalorder %s342_s20, %s1986_s3 }
  0x6a   : > { %p1989_p12 = scmp.lt.s32.totalorder %s1987_s4, %s1980_s2 }
  0x6b   : > { %p1983_p6 = pnand %p1981_p9, %p1969_p13 }
  0x6c   : > { %p1990_p7 = por %p1989_p12, %p1988_p4 }
  0x6d   : > { %p1984_p8 = pneg %p1983_p6 }
  0x6f   : > { %p1991_p5 = pnand %p1990_p7, %p1984_p8 }
  0x71   : > { %1994 = shalt.err (!%p1991_p5)
}
  0x72   : > { %s2445_s19 = smov 8   ;;  %s2446_s30 = smov 128  }
  0x73   : > { %1734 = dma.hbm_to_vmem [thread:$0]  (!%p2299_p2), %s340_s12, 768, %s342_s20, %s328_s1, %s2446_s30, %s2446_s30, %s2445_s19  }
  0x74   : > { %353 = sbr.rel (%p2180_p3) target bundleno = 974 (0x3ce), region = 48  ;;  %s2316_s22 = sand.u32 (!%p2180_p3), 1, %s2071_s25  }
  0x75   : > { %s1682_s2 = smul.u32 (!%p2180_p3), 48, %s2316_s22  ;;  %s356_s3 = scalar_lea.sflag (!%p2180_p3), [#allocation3], %s2316_s22 }
  0x77   : > { %s359_s4 = scalar_lea.vmem (!%p2180_p3), [#allocation2], %s1682_s2 }
  0x79   : > { %2046 = dma.done.wait (%p2279_p10), %s356_s3, 768  }
  0x7a   : > { %2048 = vsyncadd (%p2279_p10), %s356_s3, 4294966528 }
  0x7b   : > { %2050 = dma.done.wait (%p2175_p1), [#allocation6], 512  }
  0x7c   : > { %2052 = vsyncadd (%p2175_p1), [#allocation6], 4294966784 }
  0x7d   : > { %2054 = dma.done.wait (%p2175_p1), [#allocation9], 4096  }
  0x7e   : > { %2056 = vsyncadd (%p2175_p1), [#allocation9], 4294963200 }
  0x7f   : > { %2058 = dma.done.wait (%p2175_p1), [#allocation12], 1536  }
  0x80   : > { %2060 = vsyncadd (%p2175_p1), [#allocation12], 4294965760  ;;  %v453_v0 = vld [vmem:[%s359_s4 + $0x8] sm:$0xff]  ;;  %v455_v1 = vld [vmem:[%s359_s4 + $0x18] sm:$0xff]  ;;  %vm512_vm0 = vcmask 130048   ;;  %s413_s1 = scalar_lea.vmem [#allocation14], %s1682_s2 }
  0x81   : > { %v457_v2 = vld [vmem:[%s359_s4 + $0x28] sm:$0xff]  ;;  %v1452_v3 = vclamps-f32 %v453_v0, 1.0  ;;  %v1454_v4 = vclamps-f32 %v455_v1, 1.0  ;;  %v452_v6 = vld [vmem:[%s359_s4] sm:$0xff]  ;;  %v454_v7 = vld [vmem:[%s359_s4 + $0x10] sm:$0xff]  ;;  %s1284_s8 = sshll.u32 %s413_s1, 4  ;;  %s2365_s8 = int_to_ptr.vmem [resolvable:$true] %s1284_s8 }
  0x82   : > { %v1456_v5 = vclamps-f32 %v457_v2, 1.0  ;;  %v456_v8 = vld [vmem:[%s359_s4 + $0x20] sm:$0xff]  ;;  %v1451_v9 = vclamps-f32 %v452_v6, 1.0  ;;  %v1453_v10 = vclamps-f32 %v454_v7, 1.0  ;;  %v417_v51 = vld [vmem:[#allocation5 + $0x8] sm:$0xff]  ;;  %v451_v56 = vld [vmem:[#allocation10 + $0x78] sm:$0xff] }
  0x83   : > { %v1455_v11 = vclamps-f32 %v456_v8, 1.0  ;;  %v416_v12 = vld [vmem:[#allocation5] sm:$0xff]  ;;  %v471_v13 = vadd.f32 1.0, %v1452_v3  ;;  %v473_v14 = vadd.f32 1.0, %v1454_v4  ;;  %v450_v57 = vld [vmem:[#allocation10 + $0x70] sm:$0xff]  ;;  %v449_v58 = vld [vmem:[#allocation10 + $0x68] sm:$0xff] }
  0x84   : > { %v475_v15 = vadd.f32 1.0, %v1456_v5  ;;  %1560 = vmatprep.mubr.msk.f32.mxu0 %vm512_vm0, %v416_v12  ;;  %1567 = vmatprep.mubr.msk.f32.mxu1 %vm512_vm0, %v416_v12  ;;  %v470_v16 = vadd.f32 1.0, %v1451_v9  ;;  %v472_v17 = vadd.f32 1.0, %v1453_v10  ;;  %v448_v59 = vld [vmem:[#allocation10 + $0x60] sm:$0xff]  ;;  %v447_v60 = vld [vmem:[#allocation10 + $0x58] sm:$0xff]  ;;  %v446_v61 = vld [vmem:[#allocation10 + $0x50] sm:$0xff] }
  0x85   : > { %v474_v18 = vadd.f32 1.0, %v1455_v11  ;;  %v477_v19 = vmul.f32 127.5, %v471_v13  ;;  %v479_v20 = vmul.f32 127.5, %v473_v14  ;;  %v445_v62 = vld [vmem:[#allocation10 + $0x48] sm:$0xff]  ;;  %v444_v63 = vld [vmem:[#allocation10 + $0x40] sm:$0xff]  ;;  %v443_v0 = vld [vmem:[#allocation10 + $0x38] sm:$0xff] }
  0x86   : > { %v481_v21 = vmul.f32 127.5, %v475_v15  ;;  %v476_v22 = vmul.f32 127.5, %v470_v16  ;;  %v478_v23 = vmul.f32 127.5, %v472_v17  ;;  %v442_v1 = vld [vmem:[#allocation10 + $0x30] sm:$0xff]  ;;  %v441_v2 = vld [vmem:[#allocation10 + $0x28] sm:$0xff]  ;;  %v440_v3 = vld [vmem:[#allocation10 + $0x20] sm:$0xff] }
  0x87   : > { %v480_v24 = vmul.f32 127.5, %v474_v18  ;;  %v483_v25 = vmul.f32 0.299, %v477_v19  ;;  %v485_v26 = vmul.f32 0.587, %v479_v20  ;;  %v503_v41 = vmul.f32 0.5, %v477_v19 }
  0x88   : > { %v489_v27 = vmul.f32 0.114, %v481_v21  ;;  %v482_v28 = vmul.f32 0.299, %v476_v22  ;;  %v484_v29 = vmul.f32 0.587, %v478_v23 }
  0x89   : > { %v488_v30 = vmul.f32 0.114, %v480_v24  ;;  %v487_v31 = vadd.f32 %v485_v26, %v483_v25  ;;  %v493_v32 = vmul.f32 -0.1687, %v477_v19  ;;  %v495_v33 = vmul.f32 0.3313, %v479_v20 }
  0x8a   : > { %v499_v34 = vmul.f32 0.5, %v481_v21  ;;  %v486_v35 = vadd.f32 %v484_v29, %v482_v28  ;;  %v492_v36 = vmul.f32 -0.1687, %v476_v22  ;;  %v494_v37 = vmul.f32 0.3313, %v478_v23  ;;  %v439_v4 = vld [vmem:[#allocation10 + $0x18] sm:$0xff] }
  0x8b   : > { %v498_v38 = vmul.f32 0.5, %v480_v24  ;;  %v491_v39 = vadd.f32 %v489_v27, %v487_v31  ;;  %v497_v40 = vsub.f32 %v493_v32, %v495_v33  ;;  %v505_v42 = vmul.f32 0.4187, %v479_v20  ;;  %v438_v5 = vld [vmem:[#allocation10 + $0x10] sm:$0xff]  ;;  %v437_v6 = vld [vmem:[#allocation10 + $0x8] sm:$0xff]  ;;  %v436_v7 = vld [vmem:[#allocation10] sm:$0xff] }
  0x8c   : > { %v490_v43 = vadd.f32 %v488_v30, %v486_v35  ;;  %v496_v44 = vsub.f32 %v492_v36, %v494_v37  ;;  %v509_v45 = vmul.f32 0.0813, %v481_v21  ;;  %v502_v46 = vmul.f32 0.5, %v476_v22  ;;  %v435_v8 = vld [vmem:[#allocation8 + $0x78] sm:$0xff]  ;;  %v434_v9 = vld [vmem:[#allocation8 + $0x70] sm:$0xff]  ;;  %v433_v10 = vld [vmem:[#allocation8 + $0x68] sm:$0xff] }
  0x8d   : > { %1556 = vmatprep.subr.mxu0 %v491_v39  ;;  %v501_v47 = vadd.f32 %v499_v34, %v497_v40  ;;  %v507_v48 = vsub.f32 %v503_v41, %v505_v42  ;;  %v504_v49 = vmul.f32 0.4187, %v478_v23  ;;  %v508_v50 = vmul.f32 0.0813, %v480_v24  ;;  %v432_v11 = vld [vmem:[#allocation8 + $0x60] sm:$0xff]  ;;  %v430_v13 = vld [vmem:[#allocation8 + $0x50] sm:$0xff] }
  0x8e   : > { %1557 = vmatpush3.msra.mxu0 %v491_v39  ;;  %v500_v52 = vadd.f32 %v498_v38, %v496_v44  ;;  %v429_v14 = vld [vmem:[#allocation8 + $0x48] sm:$0xff]  ;;  %v428_v15 = vld [vmem:[#allocation8 + $0x40] sm:$0xff]  ;;  %v427_v16 = vld [vmem:[#allocation8 + $0x38] sm:$0xff]  ;;  %s1683_s9 = smul.u32 768, %s2079_s27  ;;  %s1268_s27 = scalar_lea.sflag [#allocation4], %s2316_s22 }
  0x8f   : > { %1558 = vmatprep.subr.mxu0 %v490_v43  ;;  %1563 = vmatprep.subr.mxu1 %v501_v47  ;;  %v511_v53 = vsub.f32 %v507_v48, %v509_v45  ;;  %v506_v54 = vsub.f32 %v502_v46, %v504_v49  ;;  %v426_v17 = vld [vmem:[#allocation8 + $0x30] sm:$0xff]  ;;  %v425_v24 = vld [vmem:[#allocation8 + $0x28] sm:$0xff]  ;;  %v424_v25 = vld [vmem:[#allocation8 + $0x20] sm:$0xff]  ;;  %s1995_s23 = scalar_lea.vmem %s2365_s8, 768  ;;  %s2098_s11 = smov [#allocation14]  }
  0x90   : > { %1559 = vmatpush3.msra.mxu0 %v490_v43  ;;  %1564 = vmatpush3.msra.mxu1 %v501_v47  ;;  %v423_v26 = vld [vmem:[#allocation8 + $0x18] sm:$0xff]  ;;  %v422_v27 = vld [vmem:[#allocation8 + $0x10] sm:$0xff]  ;;  %v421_v28 = vld [vmem:[#allocation8 + $0x8] sm:$0xff]  ;;  %s2370_s10 = scalar_lea.hbm %s2425_s7, %s1683_s9  ;;  %p1996_p1 = scmp.ne.s32.totalorder %s2365_s8, %s1995_s23 }
  0x91   : > { %1561 = vmatmul.mubr.msk.f32.vlgmr.msra.gmra.mxu0 %vm512_vm0, %v417_v51  ;;  %1565 = vmatprep.subr.mxu1 %v500_v52  ;;  %v510_v55 = vsub.f32 %v506_v54, %v508_v50  ;;  %v420_v29 = vld [vmem:[#allocation8] sm:$0xff]  ;;  %v840_v30 = vld [vmem:[#allocation13 + $0x8] sm:$0xff]  ;;  %v839_v32 = vld [vmem:[#allocation13] sm:$0xff]  ;;  %s1999_s12 = sshll.u32 %s2098_s11, 4  ;;  %s2000_s12 = int_to_ptr.vmem [resolvable:$false] %s1999_s12 }
  0x92   : > { %1566 = vmatpush3.msra.mxu1 %v500_v52  ;;  %1570 = vmatprep.subr.mxu0 %v511_v53  ;;  %v842_v35 = vld [vmem:[#allocation13 + $0x18] sm:$0xff]  ;;  %v841_v40 = vld [vmem:[#allocation13 + $0x10] sm:$0xff]  ;;  %v844_v46 = vld [vmem:[#allocation13 + $0x28] sm:$0xff]  ;;  %p1997_p3 = pnand %p1996_p1, %p2283_p11  ;;  %s2001_s16 = scalar_lea.vmem %s2000_s12, 1536 }
  0x93   : > { %1568 = vmatmul.mubr.msk.f32.vlgmr.msra.gmra.mxu1 %vm512_vm0, %v417_v51  ;;  %1571 = vmatpush3.msra.mxu0 %v511_v53  ;;  %v843_v53 = vld [vmem:[#allocation13 + $0x20] sm:$0xff]  ;;  %p2002_p10 = scmp.lt.s32.totalorder %s2365_s8, %s2000_s12  ;;  %p2003_p2 = scmp.lt.s32.totalorder %s2001_s16, %s1995_s23 }
  0x94   : > { %1572 = vmatprep.subr.mxu0 %v510_v55  ;;  %1574 = vmatprep.mubr.msk.f32.mxu0 %vm512_vm0, %v416_v12  ;;  %v431_v12 = vld [vmem:[#allocation8 + $0x58] sm:$0xff]  ;;  %p1998_p5 = pneg %p1997_p3 }
  0x95   : > { %1573 = vmatpush3.msra.mxu0 %v510_v55  ;;  %1577 = vmatprep.subr.mxu1 %v451_v56  ;;  %v882_v55 = vld [vmem:[#allocation11 + $0x8] sm:$0xff]  ;;  %p2004_p13 = por %p2003_p2, %p2002_p10 }
  0x96   : > { %1575 = vmatmul.mubr.msk.f32.vlgmr.msra.gmra.mxu0 %vm512_vm0, %v417_v51  ;;  %1578 = vmatpush3.msra.mxu1 %v451_v56  ;;  %v881_v51 = vld [vmem:[#allocation11] sm:$0xff] }
  0x97   : > { %1579 = vmatprep.subr.mxu1 %v450_v57  ;;  %1618 = vmatprep.subr.mxu0 %v435_v8  ;;  %p2005_p9 = pnand %p2004_p13, %p1998_p5 }
  0x98   : > { %1580 = vmatpush3.msra.mxu1 %v450_v57  ;;  %1619 = vmatpush3.msra.mxu0 %v435_v8 }
  0x99   : > { %1581 = vmatprep.subr.mxu1 %v449_v58  ;;  %1620 = vmatprep.subr.mxu0 %v434_v9 }
  0x9a   : > { %1582 = vmatpush3.msra.mxu1 %v449_v58  ;;  %1621 = vmatpush3.msra.mxu0 %v434_v9 }
  0x9b   : > { %1583 = vmatprep.subr.mxu1 %v448_v59  ;;  %1622 = vmatprep.subr.mxu0 %v433_v10 }
  0x9c   : > { %1584 = vmatpush3.msra.mxu1 %v448_v59  ;;  %1623 = vmatpush3.msra.mxu0 %v433_v10 }
  0x9d   : > { %1585 = vmatprep.subr.mxu1 %v447_v60  ;;  %1624 = vmatprep.subr.mxu0 %v432_v11 }
  0x9e   : > { %1586 = vmatpush3.msra.mxu1 %v447_v60  ;;  %1625 = vmatpush3.msra.mxu0 %v432_v11 }
  0x9f   : > { %1587 = vmatprep.subr.mxu1 %v446_v61  ;;  %1626 = vmatprep.subr.mxu0 %v431_v12 }
  0xa0   : > { %1588 = vmatpush3.msra.mxu1 %v446_v61  ;;  %1627 = vmatpush3.msra.mxu0 %v431_v12 }
  0xa1   : > { %1589 = vmatprep.subr.mxu1 %v445_v62  ;;  %1628 = vmatprep.subr.mxu0 %v430_v13 }
  0xa2   : > { %1590 = vmatpush3.msra.mxu1 %v445_v62  ;;  %1629 = vmatpush3.msra.mxu0 %v430_v13 }
  0xa3   : > { %1591 = vmatprep.subr.mxu1 %v444_v63  ;;  %1630 = vmatprep.subr.mxu0 %v429_v14 }
  0xa4   : > { %1592 = vmatpush3.msra.mxu1 %v444_v63  ;;  %1631 = vmatpush3.msra.mxu0 %v429_v14 }
  0xa5   : > { %1593 = vmatprep.subr.mxu1 %v443_v0  ;;  %1632 = vmatprep.subr.mxu0 %v428_v15 }
  0xa6   : > { %1594 = vmatpush3.msra.mxu1 %v443_v0  ;;  %1633 = vmatpush3.msra.mxu0 %v428_v15 }
  0xa7   : > { %1595 = vmatprep.subr.mxu1 %v442_v1  ;;  %1634 = vmatprep.subr.mxu0 %v427_v16 }
  0xa8   : > { %1596 = vmatpush3.msra.mxu1 %v442_v1  ;;  %1635 = vmatpush3.msra.mxu0 %v427_v16  ;;  %v885_v16 = vld [vmem:[#allocation11 + $0x20] sm:$0xff] }
  0xa9   : > { %1597 = vmatprep.subr.mxu1 %v441_v2  ;;  %1636 = vmatprep.subr.mxu0 %v426_v17 }
  0xaa   : > { %1598 = vmatpush3.msra.mxu1 %v441_v2  ;;  %1637 = vmatpush3.msra.mxu0 %v426_v17 }
  0xab   : > { %1599 = vmatprep.subr.mxu1 %v440_v3  ;;  %1638 = vmatprep.subr.mxu0 %v425_v24 }
  0xac   : > { %1600 = vmatpush3.msra.mxu1 %v440_v3  ;;  %1639 = vmatpush3.msra.mxu0 %v425_v24 }
  0xad   : > { %1601 = vmatprep.subr.mxu1 %v439_v4  ;;  %1640 = vmatprep.subr.mxu0 %v424_v25 }
  0xae   : > { %1602 = vmatpush3.msra.mxu1 %v439_v4  ;;  %1641 = vmatpush3.msra.mxu0 %v424_v25 }
  0xaf   : > { %1603 = vmatprep.subr.mxu1 %v438_v5  ;;  %1642 = vmatprep.subr.mxu0 %v423_v26 }
  0xb0   : > { %1604 = vmatpush3.msra.mxu1 %v438_v5  ;;  %1643 = vmatpush3.msra.mxu0 %v423_v26  ;;  %v883_v5 = vld [vmem:[#allocation11 + $0x10] sm:$0xff] }
  0xb1   : > { %1605 = vmatprep.subr.mxu1 %v437_v6  ;;  %1644 = vmatprep.subr.mxu0 %v422_v27 }
  0xb2   : > { %1606 = vmatpush3.msra.mxu1 %v437_v6  ;;  %1645 = vmatpush3.msra.mxu0 %v422_v27 }
  0xb3   : > { %1607 = vmatprep.subr.mxu1 %v436_v7  ;;  %1646 = vmatprep.subr.mxu0 %v421_v28 }
  0xb4   : > { %1608 = vmatpush3.msra.mxu1 %v436_v7  ;;  %1647 = vmatpush3.msra.mxu0 %v421_v28  ;;  %v884_v7 = vld [vmem:[#allocation11 + $0x18] sm:$0xff] }
  0xb5   : > { %1648 = vmatprep.subr.mxu0 %v420_v29 }
  0xb6   : > { %1649 = vmatpush3.msra.mxu0 %v420_v29 }
 0x151   : > { %v1562_v18 = vpop.f32.mrf.mxu0 }
 0x153   : > { %v585_v19 = vpop.f32.mrf.mxu0  ;;  %v1569_v20 = vpop.f32.mrf.mxu1 }
 0x154   : > { %1609 = vmatprep.mubr.f32.mxu1 %v585_v19 }
 0x155   : > { %v660_v21 = vpop.f32.mrf.mxu1  ;;  %1610 = vmatmul.mubr.f32.vlgmr.msra.gmra.mxu1 %v1562_v18  ;;  %v886_v18 = vld [vmem:[#allocation11 + $0x28] sm:$0xff] }
 0x156   : > { %1612 = vmatprep.mubr.f32.mxu1 %v660_v21  ;;  %v1576_v22 = vpop.f32.mrf.mxu0 }
 0x158   : > { %v735_v23 = vpop.f32.mrf.mxu0 }
 0x159   : > { %1613 = vmatmul.mubr.f32.gmra.mxu1 %v1569_v20 }
 0x15a   : > { %1615 = vmatprep.mubr.f32.mxu1 %v735_v23 }
 0x15d   : > { %1616 = vmatmul.mubr.f32.gmra.mxu1 %v1576_v22  ;;  %v418_v22 = vld [vmem:[#allocation7] sm:$0xff] }
 0x15e   : > { %1663 = vmatprep.mubr.msk.f32.mxu1 %vm512_vm0, %v418_v22 }
 0x215   : > { %v1611_v31 = vpop.f32.mrf.mxu1 }
 0x216   : > { %v846_v33 = vmul.f32 %v1611_v31, %v840_v30 }
 0x217   : > { %v810_v34 = vpop.f32.mrf.mxu1 }
 0x218   : > { %v852_v36 = vand.u32 2147483647, %v846_v33  ;;  %v864_v37 = vmul.f32 %v846_v33, %v846_v33  ;;  %v845_v38 = vmul.f32 %v839_v32, %v810_v34 }
 0x219   : > { %v1614_v39 = vpop.f32.mrf.mxu1 }
 0x21a   : > { %vm2344_vm1 = vcmp.lt.f32.partialorder %v852_v36, 0.5  ;;  %v870_v42 = vmul.f32 %v864_v37, %v846_v33  ;;  %v863_v43 = vmul.f32 %v845_v38, %v845_v38  ;;  %v848_v44 = vmul.f32 %v1614_v39, %v842_v35 }
 0x21b   : > { %v820_v45 = vpop.f32.mrf.mxu1  ;;  %v851_v47 = vand.u32 2147483647, %v845_v38 }
 0x21c   : > { %v869_v48 = vmul.f32 %v863_v43, %v845_v38  ;;  %v866_v49 = vmul.f32 %v848_v44, %v848_v44  ;;  %v847_v50 = vmul.f32 %v841_v40, %v820_v45  ;;  %v876_v54 = vsel %vm2344_vm1, %v870_v42, %v846_v33  ;;  %v419_v43 = vld [vmem:[#allocation7 + $0x8] sm:$0xff] }
 0x21d   : > { %v1617_v52 = vpop.f32.mrf.mxu1  ;;  %vm857_vm2 = vcmp.lt.f32.partialorder %v851_v47, 0.5  ;;  %v854_v56 = vand.u32 2147483647, %v848_v44  ;;  %v888_v4 = vmul.f32 %v882_v55, %v876_v54 }
 0x21e   : > { %v872_v57 = vmul.f32 %v866_v49, %v848_v44  ;;  %v865_v58 = vmul.f32 %v847_v50, %v847_v50  ;;  %v850_v59 = vmul.f32 %v1617_v52, %v844_v46  ;;  %v875_v60 = vsel %vm857_vm2, %v869_v48, %v845_v38 }
 0x21f   : > { %v830_v61 = vpop.f32.mrf.mxu1  ;;  %v887_v62 = vmul.f32 %v881_v51, %v875_v60  ;;  %v853_v63 = vand.u32 2147483647, %v847_v50  ;;  %vm2350_vm3 = vcmp.lt.f32.partialorder %v854_v56, 0.5 }
 0x220   : > { %v871_v1 = vmul.f32 %v865_v58, %v847_v50  ;;  %v868_v2 = vmul.f32 %v850_v59, %v850_v59  ;;  %v849_v3 = vmul.f32 %v843_v53, %v830_v61  ;;  %v878_v6 = vsel %vm2350_vm3, %v872_v57, %v848_v44 }
 0x221   : > { %1650 = vmatprep.mubr.f32.mxu0 %v887_v62  ;;  %vm859_vm4 = vcmp.lt.f32.partialorder %v853_v63, 0.5  ;;  %v856_v8 = vand.u32 2147483647, %v850_v59  ;;  %v890_v15 = vmul.f32 %v884_v7, %v878_v6 }
 0x222   : > { %v874_v9 = vmul.f32 %v868_v2, %v850_v59  ;;  %v867_v10 = vmul.f32 %v849_v3, %v849_v3  ;;  %1651 = vmatmul.mubr.f32.vlgmr.msra.gmra.mxu0 %v888_v4  ;;  %v877_v11 = vsel %vm859_vm4, %v871_v1, %v847_v50  ;;  %v855_v12 = vand.u32 2147483647, %v849_v3 }
 0x223   : > { %v889_v13 = vmul.f32 %v883_v5, %v877_v11  ;;  %vm862_vm5 = vcmp.lt.f32.partialorder %v856_v8, 0.5 }
 0x224   : > { %v873_v14 = vmul.f32 %v867_v10, %v849_v3  ;;  %vm861_vm6 = vcmp.lt.f32.partialorder %v855_v12, 0.5  ;;  %v880_v17 = vsel %vm862_vm5, %v874_v9, %v850_v59 }
 0x225   : > { %1653 = vmatprep.mubr.f32.mxu0 %v889_v13  ;;  %v892_v21 = vmul.f32 %v886_v18, %v880_v17 }
 0x226   : > { %1654 = vmatmul.mubr.f32.gmra.mxu0 %v890_v15  ;;  %v879_v19 = vsel %vm861_vm6, %v873_v14, %v849_v3 }
 0x227   : > { %v891_v20 = vmul.f32 %v885_v16, %v879_v19 }
 0x229   : > { %1656 = vmatprep.mubr.f32.mxu0 %v891_v20 }
 0x22a   : > { %1657 = vmatmul.mubr.f32.gmra.mxu0 %v892_v21 }
 0x22b   : > { %1670 = vmatprep.mubr.msk.f32.mxu0 %vm512_vm0, %v418_v22 }
 0x2e2   : > { %v1652_v23 = vpop.f32.mrf.mxu0 }
 0x2e4   : > { %v959_v24 = vpop.f32.mrf.mxu0 }
 0x2e6   : > { %v1655_v25 = vpop.f32.mrf.mxu0 }
 0x2e7   : > { %v993_v26 = vmul.f32 0.3441133, %v1655_v25  ;;  %v1001_v33 = vmul.f32 1.7719781, %v1655_v25 }
 0x2e8   : > { %v969_v27 = vpop.f32.mrf.mxu0 }
 0x2e9   : > { %v992_v28 = vmul.f32 0.3441133, %v969_v27  ;;  %v995_v30 = vsub.f32 %v1652_v23, %v993_v26  ;;  %v1000_v40 = vmul.f32 1.7719781, %v969_v27  ;;  %v1003_v44 = vadd.f32 %v1652_v23, %v1001_v33 }
 0x2ea   : > { %v1658_v29 = vpop.f32.mrf.mxu0 }
 0x2eb   : > { %v989_v31 = vmul.f32 1.4019876, %v1658_v29  ;;  %v997_v32 = vmul.f32 0.7141038, %v1658_v29  ;;  %v994_v34 = vsub.f32 %v959_v24, %v992_v28  ;;  %v1002_v45 = vadd.f32 %v1000_v40, %v959_v24 }
 0x2ec   : > { %v979_v35 = vpop.f32.mrf.mxu0 }
 0x2ed   : > { %v991_v36 = vadd.f32 %v1652_v23, %v989_v31  ;;  %v999_v37 = vsub.f32 %v995_v30, %v997_v32  ;;  %v988_v38 = vmul.f32 1.4019876, %v979_v35  ;;  %v996_v39 = vmul.f32 0.7141038, %v979_v35 }
 0x2ef   : > { %v990_v41 = vadd.f32 %v988_v38, %v959_v24  ;;  %v998_v42 = vsub.f32 %v994_v34, %v996_v39  ;;  %1659 = vmatprep.subr.mxu1 %v991_v36  ;;  %1666 = vmatprep.subr.mxu0 %v999_v37 }
 0x2f0   : > { %1660 = vmatpush3.msra.mxu1 %v991_v36  ;;  %1667 = vmatpush3.msra.mxu0 %v999_v37 }
 0x2f1   : > { %1661 = vmatprep.subr.mxu1 %v990_v41  ;;  %1668 = vmatprep.subr.mxu0 %v998_v42 }
 0x2f2   : > { %1662 = vmatpush3.msra.mxu1 %v990_v41  ;;  %1669 = vmatpush3.msra.mxu0 %v998_v42 }
 0x2f3   : > { %1673 = vmatprep.subr.mxu1 %v1003_v44  ;;  %1664 = vmatmul.mubr.msk.f32.vlgmr.msra.gmra.mxu1 %vm512_vm0, %v419_v43 }
 0x2f4   : > { %1674 = vmatpush3.msra.mxu1 %v1003_v44  ;;  %1677 = vmatprep.mubr.msk.f32.mxu1 %vm512_vm0, %v418_v22 }
 0x2f5   : > { %1675 = vmatprep.subr.mxu1 %v1002_v45  ;;  %1671 = vmatmul.mubr.msk.f32.vlgmr.msra.gmra.mxu0 %vm512_vm0, %v419_v43 }
 0x2f6   : > { %1676 = vmatpush3.msra.mxu1 %v1002_v45 }
 0x2f7   : > { %1678 = vmatmul.mubr.msk.f32.vlgmr.msra.gmra.mxu1 %vm512_vm0, %v419_v43 }
 0x3b3   : > { %v1665_v46 = vpop.f32.mrf.mxu1 }
 0x3b4   : > { %v1086_v47 = vmul.f32 0.007843138, %v1665_v46 }
 0x3b5   : > { %v1076_v48 = vpop.f32.mrf.mxu1  ;;  %v1672_v49 = vpop.f32.mrf.mxu0 }
 0x3b6   : > { %v1466_v50 = vadd.f32 -1.0, %v1086_v47  ;;  %v1085_v51 = vmul.f32 0.007843138, %v1076_v48  ;;  %v1171_v52 = vmul.f32 0.007843138, %v1672_v49 }
 0x3b7   : > { %v1679_v53 = vpop.f32.mrf.mxu1  ;;  %v1161_v54 = vpop.f32.mrf.mxu0 }
 0x3b8   : > { %v1468_v55 = vclamps-f32 %v1466_v50, 1.0  ;;  %v1465_v56 = vadd.f32 -1.0, %v1085_v51  ;;  %v1472_v57 = vadd.f32 -1.0, %v1171_v52  ;;  %v1257_v58 = vmul.f32 0.007843138, %v1679_v53 }
 0x3b9   : > { %v1170_v59 = vmul.f32 0.007843138, %v1161_v54  ;;  %v1247_v60 = vpop.f32.mrf.mxu1 }
 0x3ba   : > { %1094 = vst [vmem:[%s413_s1 + $0x8] sm:$0xff] %v1468_v55  ;;  %v1467_v61 = vclamps-f32 %v1465_v56, 1.0  ;;  %v1474_v62 = vclamps-f32 %v1472_v57, 1.0  ;;  %v1480_v63 = vadd.f32 -1.0, %v1257_v58  ;;  %v1256_v0 = vmul.f32 0.007843138, %v1247_v60 }
 0x3bb   : > { %v1471_v1 = vadd.f32 -1.0, %v1170_v59 }
 0x3bc   : > { %1093 = vst [vmem:[%s413_s1] sm:$0xff] %v1467_v61  ;;  %1476 = vst [vmem:[%s413_s1 + $0x18] sm:$0xff] %v1474_v62  ;;  %v1482_v2 = vclamps-f32 %v1480_v63, 1.0  ;;  %v1479_v3 = vadd.f32 -1.0, %v1256_v0 }
 0x3bd   : > { %v1473_v4 = vclamps-f32 %v1471_v1, 1.0 }
 0x3be   : > { %1484 = vst [vmem:[%s413_s1 + $0x28] sm:$0xff] %v1482_v2  ;;  %v1481_v5 = vclamps-f32 %v1479_v3, 1.0 }
 0x3bf   : > { %1475 = vst [vmem:[%s413_s1 + $0x10] sm:$0xff] %v1473_v4 }
 0x3c0   : > { %1483 = vst [vmem:[%s413_s1 + $0x20] sm:$0xff] %v1481_v5 }
 0x3c1   : > { %2008 = shalt.err (!%p2005_p9)
}
 0x3c2   : > { %s2009_s13 = scalar_lea.hbm %s2370_s10, 768  ;;  %s2013_s2 = scalar_lea.hbm %s2425_s7, 1536 }
 0x3c3   : > { %p2010_p6 = scmp.ne.s32.totalorder %s2370_s10, %s2009_s13  ;;  %p2014_p12 = scmp.lt.s32.totalorder %s2370_s10, %s2425_s7 }
 0x3c4   : > { %p2015_p7 = scmp.lt.s32.totalorder %s2013_s2, %s2009_s13 }
 0x3c5   : > { %p2011_p8 = pnand %p2010_p6, %p2283_p11 }
 0x3c6   : > { %p2016_p1 = por %p2015_p7, %p2014_p12 }
 0x3c7   : > { %p2012_p4 = pneg %p2011_p8 }
 0x3c9   : > { %p2017_p3 = pnand %p2016_p1, %p2012_p4 }
 0x3cb   : > { %2020 = shalt.err (!%p2017_p3)
}
 0x3cc   : > { %s2099_s1 = smov 128   ;;  %s2100_s9 = smov 8  }
 0x3cd   : > { %1710 = dma.vmem_to_hbm [thread:$0]  (%p2283_p11), %s2365_s8, 768, %s2370_s10, %s1268_s27, %s2099_s1, %s2099_s1, %s2100_s9  }
 0x3ce PF: > { %s1299_s20 = sand.u32 1, %s2067_s24   ;;  %p2451_p5 = scmp.ge.s32.totalorder %s2087_s29, 2 }
 0x3cf   : > { %s1300_s15 = scalar_lea.sflag [#allocation4], %s1299_s20 }
 0x3d0   : > { %p1736_p10 = pnand %p2451_p5, %p2290_p0 }
 0x3d2   : > { %p1737_p2 = pneg %p1736_p10 }
 0x3d4   : > { %2062 = dma.done.wait (%p1737_p2), %s1300_s15, 768  }
 0x3d5   : > { %2064 = vsyncadd (%p1737_p2), %s1300_s15, 4294966528  ;;  %s26_s29 = sadd.s32 1, %s2087_s29   ;;  %s2452_s24 = smov %s2071_s25 }
 0x3d6   : > { %p23_p13 = scmp.ge.s32.totalorder %s26_s29, 4   ;;  %s2453_s25 = smov %s2075_s26 }
 0x3d7   : > { %s2454_s26 = smov %s2288_s14  ;;  %s2455_s27 = smov %s2083_s28 }
 0x3d8   : > { %s2456_s28 = smov %s2458_s17  ;;  %25 = sbr.rel (!%p23_p13) target bundleno = 14 (0xe), region = 119 }
 0x3dd   :  { %1305 = vsyncpa [#allocation3], 1 }
 0x3de   :  { %1307 = vsyncpa [#allocation3 + $0x1], 1 }
 0x3df   :  { %1308 = vsyncpa [#allocation6], 1 }
 0x3e0   :  { %1309 = vsyncpa [#allocation9], 1 }
 0x3e1   :  { %1310 = vsyncpa [#allocation12], 1 }
 0x3e2   :  { %1311 = vsyncpa [#allocation4], 1 }
 0x3e3   :  { %1313 = vsyncpa [#allocation4 + $0x1], 1 }

</bundles_post_ra>
